<compile_context>
chip_gen: v5e
topology: v5e:2x2
jax: 0.10.0
libtpu: 0.0.40
codegen_flags: <defaults>
</compile_context>

<pallas_src>
import functools
import math

import jax
import jax.numpy as jnp
from jax import lax
from jax.experimental import pallas as pl
from jax.experimental.pallas import tpu as pltpu


def _round_up(n, m):
    return ((n + m - 1) // m) * m


def _maskblock_kernel(x_ref, w1_ref, b1_ref, w2_ref, b2_ref, out_ref, *, exact_sigmoid):
    # x:  (TB, F)   native activation dtype (cast to MXU dtype in-kernel)
    # w1: (2F, F)   MXU dtype (bf16 default)     b1: (1, 2F) f32
    # w2: (F, 2F)   MXU dtype                    b2: (F, 1)  f32
    # out: (F, TB)  transposed layout, TB (multiple of 128) on the lane axis.
    x = x_ref[...].astype(w1_ref.dtype)            # in-kernel VPU cast (hidden under DMA/MXU)
    w1 = w1_ref[...]

    # hidden = relu(x @ W1^T + b1) -> (TB, 2F); contraction on last dims, no transpose.
    h = lax.dot_general(
        x, w1,
        dimension_numbers=(((1,), (1,)), ((), ())),
        preferred_element_type=jnp.float32,
    )
    h = jnp.maximum(h + b1_ref[...], 0.0)           # f32 VPU math

    w2 = w2_ref[...]
    # mask^T = W2 @ H^T -> (F, TB); again a last-dims contraction, so the transposed
    # output comes straight off the MXU (no XLU transpose, no wrapper .T).
    y = lax.dot_general(
        w2, h.astype(w2.dtype),
        dimension_numbers=(((1,), (1,)), ((), ())),
        preferred_element_type=jnp.float32,
    )
    z = y + b2_ref[...]                              # (F, TB) + (F, 1)
    if exact_sigmoid:
        z = jax.nn.sigmoid(z)
    else:
        # sigmoid(z) = 1 / (1 + exp(-z)); exp + approx reciprocal both run on the EUP.
        z = pl.reciprocal(1.0 + jnp.exp(-z), approx=True)

    out_ref[...] = z.astype(out_ref.dtype)           # lane-dense store (TB on lanes)


def prepare_maskblock_params(w1, b1, w2, b2, *, mxu_dtype=jnp.bfloat16):
    """One-time conversion to kernel-ready layout/dtypes (do NOT redo this per call)."""
    return (
        w1.astype(mxu_dtype),                 # (2F, F)
        b1.reshape(1, -1).astype(jnp.float32),  # (1, 2F)
        w2.astype(mxu_dtype),                 # (F, 2F)
        b2.reshape(-1, 1).astype(jnp.float32),  # (F, 1) -> broadcasts along lanes
    )


def maskblock_forward(x, params, *, batch_tile=512, out_dtype=None, exact_sigmoid=False):
    """MaskBlock forward. x: (B, F); params from prepare_maskblock_params.

    Returns the mask in the torch layout (F, B).
    """
    w1, b1, w2, b2 = params
    B, F = x.shape
    assert w1.shape == (2 * F, F) and w2.shape == (F, 2 * F)
    assert b1.shape == (1, 2 * F) and b2.shape == (F, 1)

    if out_dtype is None:
        out_dtype = x.dtype

    # --- batch tiling: tb is always a multiple of 128 (it becomes the output lane dim).
    batch_tile = _round_up(max(batch_tile, 128), 128)
    tb = batch_tile
    if B <= tb:
        # Shrink the tile so the grid keeps >= 2 steps when the batch allows it
        # (v7x second TensorCore + DMA/compute overlap), never below 128 lanes.
        tb = max(128, _round_up((B + 1) // 2, 128))
    Bp = _round_up(B, tb)                     # pad instead of one-huge-block fallback
    grid = (Bp // tb,)
    if Bp != B:
        x = jnp.pad(x, ((0, Bp - B), (0, 0)))

    # --- explicit VMEM budget: double-buffered act/out tiles + resident weights + headroom.
    isz = lambda dt: jnp.dtype(dt).itemsize
    est = (
        2 * tb * F * isz(x.dtype)                       # x tiles (double-buffered)
        + 2 * tb * F * isz(out_dtype)                   # out tiles (double-buffered)
        + 2 * (w1.size * isz(w1.dtype) + w2.size * isz(w2.dtype))  # resident weights
        + 2 * (b1.size + b2.size) * 4
        + 4 * tb * 2 * F * 4                            # in-kernel f32 temporaries (h, y, ...)
    )
    vmem_limit = int(min(max(2 * est, 16 * 1024 * 1024), 64 * 1024 * 1024))

    kernel = functools.partial(_maskblock_kernel, exact_sigmoid=exact_sigmoid)

    out = pl.pallas_call(
        kernel,
        out_shape=jax.ShapeDtypeStruct((F, Bp), out_dtype),
        grid_spec=pltpu.PrefetchScalarGridSpec(
            num_scalar_prefetch=0,
            grid=grid,
            in_specs=[
                pl.BlockSpec((tb, F), lambda i: (i, 0)),        # activations: tiled over batch
                pl.BlockSpec((2 * F, F), lambda i: (0, 0)),     # W1: resident
                pl.BlockSpec((1, 2 * F), lambda i: (0, 0)),     # b1: resident
                pl.BlockSpec((F, 2 * F), lambda i: (0, 0)),     # W2: resident
                pl.BlockSpec((F, 1), lambda i: (0, 0)),         # b2: resident
            ],
            out_specs=pl.BlockSpec((F, tb), lambda i: (0, i)),  # (F, B): final layout, lane-dense
        ),
        compiler_params=pltpu.CompilerParams(
            dimension_semantics=("parallel",),
            vmem_limit_bytes=vmem_limit,
        ),
    )(x, w1, b1, w2, b2)

    if Bp != B:
        out = out[:, :B]
    return out


def init_maskblock_params(key, out_features):
    """Deterministic init mimicking the torch module's init scheme (f32)."""
    F = out_features
    k1, k2 = jax.random.split(key, 2)

    # extractor.weight: (2F, F), kaiming_uniform_ fan_in, relu gain = sqrt(2)
    fan_in_e = F
    bound_e = math.sqrt(2.0) * math.sqrt(3.0 / fan_in_e)
    w1 = jax.random.uniform(k1, (2 * F, F), jnp.float32, -bound_e, bound_e)
    b1 = jnp.zeros((2 * F,), jnp.float32)

    # projector.weight: (F, 2F), xavier_uniform_
    fan_in_p, fan_out_p = 2 * F, F
    bound_p = math.sqrt(6.0 / (fan_in_p + fan_out_p))
    w2 = jax.random.uniform(k2, (F, 2 * F), jnp.float32, -bound_p, bound_p)
    b2 = jnp.zeros((F,), jnp.float32)

    return w1, b1, w2, b2


if __name__ == "__main__":
    key = jax.random.PRNGKey(0)
    k_x, k_p, k_x2 = jax.random.split(key, 3)

    # MXU/lane-friendly small shapes: F a multiple of 128, B = two batch tiles of 128.
    B, F = 256, 128
    x = jax.random.normal(k_x, (B, F), dtype=jnp.float32)
    w1, b1, w2, b2 = init_maskblock_params(k_p, F)

    # Pure-JAX f32 reference (exact torch semantics, including the trailing .t()).
    ref = jax.nn.sigmoid(jnp.maximum(x @ w1.T + b1, 0.0) @ w2.T + b2).T

    # Fast path: bf16 resident weights, f32 accumulation, EUP sigmoid, (F, B) output.
    params_bf16 = prepare_maskblock_params(w1, b1, w2, b2)          # converted once
    out = jax.block_until_ready(maskblock_forward(x, params_bf16))
    assert out.shape == (F, B)
    assert jnp.allclose(out, ref, atol=2e-2, rtol=2e-2), "bf16 path drifted too far"

    # f32 MXU + exact sigmoid path: tight numerical check of the kernel logic.
    params_f32 = prepare_maskblock_params(w1, b1, w2, b2, mxu_dtype=jnp.float32)
    out_f32 = jax.block_until_ready(
        maskblock_forward(x, params_f32, exact_sigmoid=True))
    assert jnp.allclose(out_f32, ref, atol=1e-4, rtol=1e-4), "f32 path mismatch"

    # Ragged batch: exercises the pad-to-tile + post-slice path (grid stays >= 2).
    B2 = 200
    x2 = jax.random.normal(k_x2, (B2, F), dtype=jnp.float32)
    ref2 = jax.nn.sigmoid(jnp.maximum(x2 @ w1.T + b1, 0.0) @ w2.T + b2).T
    out2 = jax.block_until_ready(maskblock_forward(x2, params_bf16))
    assert out2.shape == (F, B2)
    assert jnp.allclose(out2, ref2, atol=2e-2, rtol=2e-2), "padded path mismatch"

    print("KERNEL_OK")
</pallas_src>

<mosaic_0001>
module attributes {stable_mosaic.version = 11 : i64} {
  func.func @_maskblock_kernel(%arg0: i32, %arg1: memref<128x128xf32, #tpu.memory_space<vmem>>, %arg2: memref<256x128xbf16, #tpu.memory_space<vmem>>, %arg3: memref<1x256xf32, #tpu.memory_space<vmem>>, %arg4: memref<128x256xbf16, #tpu.memory_space<vmem>>, %arg5: memref<128x1xf32, #tpu.memory_space<vmem>>, %arg6: memref<128x128xf32, #tpu.memory_space<vmem>>) attributes {dimension_semantics = [#tpu.dimension_semantics<parallel>], iteration_bounds = array<i64: 2>, scalar_prefetch = 0 : i64, scratch_operands = 0 : i64, tpu.core_type = #tpu.core_type<tc>, window_params = [{transform_indices = @transform_0, window_bounds = array<i64: 128, 128>}, {pipeline_mode = #tpu.pipeline_mode<synchronous>, transform_indices = @transform_1, window_bounds = array<i64: 256, 128>}, {pipeline_mode = #tpu.pipeline_mode<synchronous>, transform_indices = @transform_2, window_bounds = array<i64: 1, 256>}, {pipeline_mode = #tpu.pipeline_mode<synchronous>, transform_indices = @transform_3, window_bounds = array<i64: 128, 256>}, {pipeline_mode = #tpu.pipeline_mode<synchronous>, transform_indices = @transform_4, window_bounds = array<i64: 128, 1>}, {transform_indices = @transform_5, window_bounds = array<i64: 128, 128>}]} {
    %c0 = arith.constant 0 : index
    %c0_0 = arith.constant 0 : index
    %0 = vector.load %arg1[%c0, %c0_0] : memref<128x128xf32, #tpu.memory_space<vmem>>, vector<128x128xf32>
    %1 = arith.truncf %0 : vector<128x128xf32> to vector<128x128xbf16>
    %c0_1 = arith.constant 0 : index
    %c0_2 = arith.constant 0 : index
    %2 = vector.load %arg2[%c0_1, %c0_2] : memref<256x128xbf16, #tpu.memory_space<vmem>>, vector<256x128xbf16>
    %cst = arith.constant dense<0.000000e+00> : vector<128x256xf32>
    %3 = tpu.matmul %1, %2, %cst {dimension_numbers = #tpu.dot_dimension_numbers<[1], [1], [0], [0], [0, 0, 1, 0], [], []>} : vector<128x128xbf16>, vector<256x128xbf16>, vector<128x256xf32> -> vector<128x256xf32>
    %c0_3 = arith.constant 0 : index
    %c0_4 = arith.constant 0 : index
    %4 = vector.load %arg3[%c0_3, %c0_4] : memref<1x256xf32, #tpu.memory_space<vmem>>, vector<1x256xf32>
    %5 = vector.broadcast %4 : vector<1x256xf32> to vector<128x256xf32>
    %6 = arith.addf %3, %5 : vector<128x256xf32>
    %cst_5 = arith.constant 0.000000e+00 : f32
    %7 = vector.broadcast %cst_5 : f32 to vector<128x256xf32>
    %8 = arith.maximumf %6, %7 : vector<128x256xf32>
    %c0_6 = arith.constant 0 : index
    %c0_7 = arith.constant 0 : index
    %9 = vector.load %arg4[%c0_6, %c0_7] : memref<128x256xbf16, #tpu.memory_space<vmem>>, vector<128x256xbf16>
    %10 = arith.truncf %8 : vector<128x256xf32> to vector<128x256xbf16>
    %cst_8 = arith.constant dense<0.000000e+00> : vector<128x128xf32>
    %11 = tpu.matmul %9, %10, %cst_8 {dimension_numbers = #tpu.dot_dimension_numbers<[1], [1], [0], [0], [0, 0, 1, 0], [], []>} : vector<128x256xbf16>, vector<128x256xbf16>, vector<128x128xf32> -> vector<128x128xf32>
    %c0_9 = arith.constant 0 : index
    %c0_10 = arith.constant 0 : index
    %12 = vector.load %arg5[%c0_9, %c0_10] : memref<128x1xf32, #tpu.memory_space<vmem>>, vector<128x1xf32>
    %13 = vector.broadcast %12 : vector<128x1xf32> to vector<128x128xf32>
    %14 = arith.addf %11, %13 : vector<128x128xf32>
    %cst_11 = arith.constant 0.000000e+00 : f32
    %15 = vector.broadcast %cst_11 : f32 to vector<128x128xf32>
    %16 = arith.subf %15, %14 : vector<128x128xf32>
    %17 = math.exp %16 : vector<128x128xf32>
    %cst_12 = arith.constant 1.000000e+00 : f32
    %18 = vector.broadcast %cst_12 : f32 to vector<128x128xf32>
    %19 = arith.addf %18, %17 : vector<128x128xf32>
    %20 = tpu.reciprocal %19 {approx = true} : vector<128x128xf32> -> vector<128x128xf32>
    %c0_13 = arith.constant 0 : index
    %c0_14 = arith.constant 0 : index
    %21 = vector.load %arg6[%c0_13, %c0_14] : memref<128x128xf32, #tpu.memory_space<vmem>>, vector<128x128xf32>
    tpu.vector_store %arg6[%c0_13, %c0_14], %20 {strides = array<i32>} : memref<128x128xf32, #tpu.memory_space<vmem>>, vector<128x128xf32>,
    return
  }
  func.func @transform_0(%arg0: i32) -> (i32, i32) {
    %c0_i32 = arith.constant 0 : i32
    %c0_i32_0 = arith.constant 0 : i32
    return %arg0, %c0_i32 : i32, i32
  }
  func.func @transform_1(%arg0: i32) -> (i32, i32) {
    %c0_i32 = arith.constant 0 : i32
    %c0_i32_0 = arith.constant 0 : i32
    %c0_i32_1 = arith.constant 0 : i32
    return %c0_i32, %c0_i32_0 : i32, i32
  }
  func.func @transform_2(%arg0: i32) -> (i32, i32) {
    %c0_i32 = arith.constant 0 : i32
    %c0_i32_0 = arith.constant 0 : i32
    %c0_i32_1 = arith.constant 0 : i32
    return %c0_i32, %c0_i32_0 : i32, i32
  }
  func.func @transform_3(%arg0: i32) -> (i32, i32) {
    %c0_i32 = arith.constant 0 : i32
    %c0_i32_0 = arith.constant 0 : i32
    %c0_i32_1 = arith.constant 0 : i32
    return %c0_i32, %c0_i32_0 : i32, i32
  }
  func.func @transform_4(%arg0: i32) -> (i32, i32) {
    %c0_i32 = arith.constant 0 : i32
    %c0_i32_0 = arith.constant 0 : i32
    %c0_i32_1 = arith.constant 0 : i32
    return %c0_i32, %c0_i32_0 : i32, i32
  }
  func.func @transform_5(%arg0: i32) -> (i32, i32) {
    %c0_i32 = arith.constant 0 : i32
    %c0_i32_0 = arith.constant 0 : i32
    return %c0_i32, %arg0 : i32, i32
  }
}

</mosaic_0001>

<bundles_post_ra>
// kernel: tpu_custom_call.1
= control target key start
LH: loop header
LB: loop body
LE: loop exit
PB: predicated region body
PF: predicated region fallthrough
CT: control target
= control target key end

     0   :  { %s1934_s0 = inlined_call_operand.hbm [shape: f32[256,128], index: 0, kind: input, shape index: {}]   ;;  %s1935_s1 = inlined_call_operand.vmem [shape: bf16[256,128], index: 1, kind: input, shape index: {}]   ;;  %s1936_s2 = inlined_call_operand.hbm [shape: f32[1,256], index: 2, kind: input, shape index: {}]   ;;  %s1937_s3 = inlined_call_operand.hbm [shape: bf16[128,256], index: 3, kind: input, shape index: {}]   ;;  %s1938_s4 = inlined_call_operand.vmem [shape: f32[128,1], index: 4, kind: input, shape index: {}]   ;;  %s1939_s5 = inlined_call_operand.hbm [shape: f32[128,256], index: 5, kind: output, shape index: {}]  }
   0x1   :  { %1941 = sst [smem:[#allocation14_spill]] %s1936_s2 }
   0x2   :  { %1942 = sst [smem:[#allocation15_spill]] %s1937_s3 }
   0x3   :  { %10 = vsyncpa [#allocation3], 0 }
   0x4   :  { %12 = vsyncpa [#allocation3 + $0x1], 0 }
   0x5   :  { %13 = vsyncpa [#allocation6], 0 }
   0x6   :  { %14 = vsyncpa [#allocation4], 0 }
   0x7   :  { %16 = vsyncpa [#allocation4 + $0x1], 0  ;;  %s1592_s18 = smov 0   ;;  %s1594_s19 = smov 0  }
   0x8   :  { %s1596_s20 = smov 0   ;;  %s1598_s21 = smov 0  }
   0x9 LB: > { %1943 = sst [smem:[#allocation12_spill]] %s1548_s20  ;;  %s1613_s22 = sadd.s32 4294967295, %s1552_s21   ;;  %s1552_s21 = sphi %s1598_s21, %s1958_s21   ;;  %s1548_s20 = sphi %s1596_s20, %s1955_s20   ;;  %s1544_s19 = sphi %s1594_s19, %s1957_s19   ;;  %s1540_s18 = sphi %s1592_s18, %s1956_s18  }
   0xa   : > { %s1074_s23 = sadd.s32 4294967294, %s1552_s21   ;;  %s1617_s24 = sadd.s32 1, %s1552_s21  }
   0xb   : > { %s29_s25 = sadd.s32 1, %s1548_s20  ;;  %s26_s26 = ssub.s32 %s1552_s21, %s1617_s24 }
   0xc   : > { %p36_p0 = scmp.ne.s32.totalorder %s1548_s20, %s1544_s19  ;;  %p27_p1 = scmp.eq.s32.totalorder %s26_s26, 0 }
   0xd   : > { %p37_p2 = scmp.eq.s32.totalorder %s1552_s21, 0  ;;  %p42_p3 = scmp.ne.s32.totalorder %s1544_s19, %s1540_s18 }
   0xe   : > { %p43_p4 = scmp.eq.s32.totalorder %s1613_s22, 0  ;;  %p150_p7 = scmp.eq.s32.totalorder %s1613_s22, 1 }
   0xf   : > { %s1629_s27 = scalar_select %p27_p1, %s1548_s20, %s29_s25  }
  0x10   : > { %p1631_p5 = por %p37_p2, %p36_p0  ;;  %p1637_p6 = por %p43_p4, %p42_p3 }
  0x11   : > { %1944 = sst [smem:[#allocation13_spill]] %s1629_s27  ;;  %p156_p8 = scmp.eq.s32.totalorder %s1074_s23, 1 }
  0x12   : > { %p1075_p9 = scmp.ge.s32.totalorder %s1552_s21, 1  ;;  %p163_p10 = scmp.lt.s32.totalorder %s1552_s21, 3 }
  0x13   : > { %p1644_p11 = por %p150_p7, %p36_p0  ;;  %p1648_p12 = por %p156_p8, %p42_p3 }
  0x14   : > { %p1652_p13 = pnand %p1075_p9, %p163_p10  ;;  %s1950_s2 = sld [smem:[#allocation14_spill]] }
  0x15   : > { %s1554_s11 = smov [#allocation5]   ;;  %p1281_p3 = scmp.lt.s32.totalorder %s1552_s21, 2 }
  0x16   : > { %p1264_p1 = pneg %p1652_p13  ;;  %s180_s12 = sshll.u32 %s1554_s11, 4  ;;  %s181_s12 = int_to_ptr.vmem [resolvable:$true] %s180_s12 }
  0x17   : > { %s1951_s3 = sld [smem:[#allocation15_spill]]  ;;  %p1670_p7 = pnand %p1281_p3, %p1631_p5 }
  0x18   : > { %p1265_p2 = pnand %p1264_p1, %p43_p4  ;;  %s1555_s17 = smov [#allocation7]  }
  0x19   : > { %s191_s23 = sshll.u32 %s1555_s17, 4  ;;  %s208_s25 = sand.u32 1, %s1548_s20   ;;  %s192_s23 = int_to_ptr.vmem [resolvable:$true] %s191_s23 }
  0x1a   : > { %s178_s10 = sshll.u32 %s1950_s2, 4  ;;  %s1556_s26 = smov 128   ;;  %s179_s10 = int_to_ptr.hbm [resolvable:$true] %s178_s10 }
  0x1b   : > { %1267 = dma.hbm_to_vmem [thread:$0]  (!%p1265_p2), %s179_s10, 32, %s181_s12, [#allocation6]  }
  0x1c   : > { %s1557_s8 = smov 8   ;;  %s1079_s9 = sshll.u32 %s208_s25, 7 }
  0x1d   : > { %s189_s15 = sshll.u32 %s1951_s3, 4  ;;  %s1219_s11 = sshll.u32 %s1552_s21, 7  ;;  %s190_s15 = int_to_ptr.hbm [resolvable:$true] %s189_s15 }
  0x1e   : > { %1270 = dma.hbm_to_vmem [thread:$0]  (!%p1265_p2), %s190_s15, 2048, %s192_s23, [#allocation6], %s1556_s26, %s1556_s26, %s1557_s8  }
  0x1f   : > { %s217_s14 = scalar_lea.hbm %s1934_s0, %s1219_s11  ;;  %s212_s10 = scalar_lea.vmem [#allocation2], %s1079_s9 }
  0x20   : > { %s220_s28 = sshll.u32 %s212_s10, 4  ;;  %s218_s12 = sshll.u32 %s217_s14, 4  ;;  %s221_s28 = int_to_ptr.vmem [resolvable:$true] %s220_s28  ;;  %s219_s12 = int_to_ptr.hbm [resolvable:$true] %s218_s12 }
  0x21   : > { %s209_s3 = scalar_lea.sflag [#allocation3], %s208_s25  ;;  %s1452_s27 = sshra.s32 %s219_s12, 4  ;;  %s1453_s27 = int_to_ptr.hbm [resolvable:$true] %s1452_s27 }
  0x22   : > { %s1454_s17 = scalar_lea.hbm %s1453_s27, 128  ;;  %p1456_p8 = pneg %p1670_p7 }
  0x23   : > { %p1455_p5 = scmp.ne.s32.totalorder %s1453_s27, %s1454_s17  ;;  %s1459_s20 = scalar_lea.hbm %s1934_s0, 256 }
  0x24   : > { %p1460_p1 = scmp.lt.s32.totalorder %s1453_s27, %s1934_s0  ;;  %p1461_p2 = scmp.lt.s32.totalorder %s1459_s20, %s1454_s17 }
  0x25   : > { %p1457_p9 = pnand %p1456_p8, %p1455_p5 }
  0x26   : > { %p1462_p3 = por %p1461_p2, %p1460_p1 }
  0x27   : > { %p1458_p10 = pneg %p1457_p9 }
  0x29   : > { %p1463_p0 = pnand %p1462_p3, %p1458_p10 }
  0x2b   : > { %1466 = shalt.err (!%p1463_p0)
}
  0x2c   : > { %1274 = dma.hbm_to_vmem [thread:$0]  (!%p1670_p7), %s219_s12, 2048, %s221_s28, %s209_s3, %s1556_s26, %s1556_s26, %s1557_s8  }
  0x2d   : > { %232 = sbr.rel (%p1652_p13) target bundleno = 713 (0x2c9), region = 40  ;;  %s1692_s25 = sand.u32 (!%p1652_p13), 1, %s1544_s19  }
  0x2e   : > { %s1083_s9 = sshll.u32 (!%p1652_p13), %s1692_s25, 7  ;;  %s235_s13 = scalar_lea.sflag (!%p1652_p13), [#allocation3], %s1692_s25 }
  0x2f   : > { %s1698_s20 = scalar_lea.vmem (!%p1652_p13), [#allocation2], %s1083_s9 }
  0x32   : > { %1527 = dma.done.wait (%p1637_p6), %s235_s13, 2048  }
  0x33   : > { %1529 = vsyncadd (%p1637_p6), %s235_s13, 4294965248 }
  0x34   : > { %1531 = dma.done.wait (%p43_p4), [#allocation6], 2080  }
  0x35   : > { %1533 = vsyncadd (%p43_p4), [#allocation6], 4294965216  ;;  %v1227_v0 = vld [vmem:[%s1935_s1 + $0x38] sm:$0xff]  ;;  %v1226_v2 = vld [vmem:[%s1935_s1 + $0x30] sm:$0xff]  ;;  %s1882_s17 = scalar_lea.vmem [#allocation8], %s1083_s9  ;;  %s1216_s9 = sshll.u32 %s1613_s22, 3 }
  0x36   : > { %v1235_v1 = vld [vmem:[%s1935_s1 + $0x78] sm:$0xff]  ;;  %435 = vmatpush.bf16.xpose.msra.mxu0 %v1227_v0  ;;  %v1234_v3 = vld [vmem:[%s1935_s1 + $0x70] sm:$0xff]  ;;  %v1225_v4 = vld [vmem:[%s1935_s1 + $0x28] sm:$0xff]  ;;  %s978_s2 = scalar_lea.hbm %s1939_s5, %s1216_s9  ;;  %s968_s13 = scalar_lea.sflag [#allocation4], %s1692_s25 }
  0x37   : > { %484 = vmatpush.bf16.xpose.msra.mxu1 %v1235_v1  ;;  %v1233_v5 = vld [vmem:[%s1935_s1 + $0x68] sm:$0xff]  ;;  %v1224_v6 = vld [vmem:[%s1935_s1 + $0x20] sm:$0xff]  ;;  %v1223_v8 = vld [vmem:[%s1935_s1 + $0x18] sm:$0xff]  ;;  %s981_s11 = sshll.u32 %s978_s2, 4  ;;  %s1502_s16 = scalar_lea.hbm %s1939_s5, 256  ;;  %s982_s11 = int_to_ptr.hbm [resolvable:$true] %s981_s11 }
  0x38   : > { %v1232_v7 = vld [vmem:[%s1935_s1 + $0x60] sm:$0xff]  ;;  %v1231_v9 = vld [vmem:[%s1935_s1 + $0x58] sm:$0xff]  ;;  %v1222_v10 = vld [vmem:[%s1935_s1 + $0x10] sm:$0xff]  ;;  %s1496_s3 = sshra.s32 %s982_s11, 4  ;;  %s1497_s3 = int_to_ptr.hbm [resolvable:$true] %s1496_s3 }
  0x39   : > { %v1230_v11 = vld [vmem:[%s1935_s1 + $0x50] sm:$0xff]  ;;  %v1221_v12 = vld [vmem:[%s1935_s1 + $0x8] sm:$0xff]  ;;  %v1220_v14 = vld [vmem:[%s1935_s1] sm:$0xff]  ;;  %s1498_s22 = scalar_lea.hbm %s1497_s3, 128  ;;  %p1503_p0 = scmp.lt.s32.totalorder %s1497_s3, %s1939_s5 }
  0x3a   : > { %v1229_v13 = vld [vmem:[%s1935_s1 + $0x48] sm:$0xff]  ;;  %v1228_v15 = vld [vmem:[%s1935_s1 + $0x40] sm:$0xff]  ;;  %v279_v19 = vld [vmem:[%s1698_s20 + $0x10] sm:$0xff]  ;;  %p1499_p4 = scmp.ne.s32.totalorder %s1497_s3, %s1498_s22  ;;  %p1504_p7 = scmp.lt.s32.totalorder %s1502_s16, %s1498_s22 }
  0x3b   : > { %v277_v16 = vld [vmem:[%s1698_s20] sm:$0xff]  ;;  %v278_v17 = vld [vmem:[%s1698_s20 + $0x8] sm:$0xff]  ;;  %v280_v20 = vld [vmem:[%s1698_s20 + $0x18] sm:$0xff] }
  0x3c   : > { %v293_v18 = vpack.c.bf16 %v278_v17, %v277_v16  ;;  %v294_v21 = vpack.c.bf16 %v280_v20, %v279_v19  ;;  %v281_v22 = vld [vmem:[%s1698_s20 + $0x20] sm:$0xff]  ;;  %v282_v23 = vld [vmem:[%s1698_s20 + $0x28] sm:$0xff]  ;;  %v283_v25 = vld [vmem:[%s1698_s20 + $0x30] sm:$0xff]  ;;  %p1500_p6 = pnand %p1499_p4, %p1644_p11  ;;  %p1505_p5 = por %p1504_p7, %p1503_p0 }
  0x3d   : > { %v295_v24 = vpack.c.bf16 %v282_v23, %v281_v22  ;;  %v284_v26 = vld [vmem:[%s1698_s20 + $0x38] sm:$0xff]  ;;  %v285_v28 = vld [vmem:[%s1698_s20 + $0x40] sm:$0xff]  ;;  %v286_v29 = vld [vmem:[%s1698_s20 + $0x48] sm:$0xff] }
  0x3e   : > { %436 = vmatpush.bf16.xpose.msra.mxu0 %v1226_v2  ;;  %v296_v27 = vpack.c.bf16 %v284_v26, %v283_v25  ;;  %v297_v30 = vpack.c.bf16 %v286_v29, %v285_v28  ;;  %v287_v31 = vld [vmem:[%s1698_s20 + $0x50] sm:$0xff]  ;;  %v288_v32 = vld [vmem:[%s1698_s20 + $0x58] sm:$0xff]  ;;  %v289_v34 = vld [vmem:[%s1698_s20 + $0x60] sm:$0xff]  ;;  %p1501_p13 = pneg %p1500_p6 }
  0x3f   : > { %485 = vmatpush.bf16.xpose.msra.mxu1 %v1234_v3  ;;  %v298_v33 = vpack.c.bf16 %v288_v32, %v287_v31  ;;  %v290_v35 = vld [vmem:[%s1698_s20 + $0x68] sm:$0xff]  ;;  %v291_v37 = vld [vmem:[%s1698_s20 + $0x70] sm:$0xff]  ;;  %v292_v38 = vld [vmem:[%s1698_s20 + $0x78] sm:$0xff]  ;;  %s979_s20 = sshll.u32 %s1882_s17, 4  ;;  %s980_s20 = int_to_ptr.vmem [resolvable:$true] %s979_s20 }
  0x40   : > { %v299_v36 = vpack.c.bf16 %v290_v35, %v289_v34  ;;  %v300_v39 = vpack.c.bf16 %v292_v38, %v291_v37  ;;  %v333_v40 = vld [vmem:[#allocation5] sm:$0x3]  ;;  %p1506_p8 = pnand %p1505_p5, %p1501_p13 }
  0x41   : > { %v1772_v43 = vperm.slane %v333_v40, 0  ;;  %v1774_v44 = vperm.slane %v333_v40, 1 }
  0x46   : > { %437 = vmatpush.bf16.xpose.msra.mxu0 %v1225_v4 }
  0x47   : > { %486 = vmatpush.bf16.xpose.msra.mxu1 %v1233_v5 }
  0x4e   : > { %438 = vmatpush.bf16.xpose.msra.mxu0 %v1224_v6 }
  0x4f   : > { %487 = vmatpush.bf16.xpose.msra.mxu1 %v1232_v7 }
  0x56   : > { %439 = vmatpush.bf16.xpose.msra.mxu0 %v1223_v8 }
  0x57   : > { %488 = vmatpush.bf16.xpose.msra.mxu1 %v1231_v9 }
  0x5e   : > { %440 = vmatpush.bf16.xpose.msra.mxu0 %v1222_v10 }
  0x5f   : > { %489 = vmatpush.bf16.xpose.msra.mxu1 %v1230_v11 }
  0x66   : > { %441 = vmatpush.bf16.xpose.msra.mxu0 %v1221_v12 }
  0x67   : > { %490 = vmatpush.bf16.xpose.msra.mxu1 %v1229_v13 }
  0x6e   : > { %442 = vmatpush.bf16.xpose.msra.mxu0 %v1220_v14 }
  0x6f   : > { %491 = vmatpush.bf16.xpose.msra.mxu1 %v1228_v15 }
  0x75   : > { %443 = vmatmul.bf16.vlgmr.msra.gmra.mxu0 %v293_v18 }
  0x76   : > { %492 = vmatmul.bf16.vlgmr.msra.gmra.mxu1 %v293_v18 }
  0x85   : > { %448 = vmatmul.bf16.gmra.mxu0 %v294_v21 }
  0x86   : > { %497 = vmatmul.bf16.gmra.mxu1 %v294_v21 }
  0x95   : > { %453 = vmatmul.bf16.gmra.mxu0 %v295_v24 }
  0x96   : > { %502 = vmatmul.bf16.gmra.mxu1 %v295_v24 }
  0xa5   : > { %458 = vmatmul.bf16.gmra.mxu0 %v296_v27 }
  0xa6   : > { %507 = vmatmul.bf16.gmra.mxu1 %v296_v27 }
  0xb5   : > { %463 = vmatmul.bf16.gmra.mxu0 %v297_v30 }
  0xb6   : > { %512 = vmatmul.bf16.gmra.mxu1 %v297_v30 }
  0xc5   : > { %468 = vmatmul.bf16.gmra.mxu0 %v298_v33 }
  0xc6   : > { %517 = vmatmul.bf16.gmra.mxu1 %v298_v33 }
  0xd5   : > { %473 = vmatmul.bf16.gmra.mxu0 %v299_v36 }
  0xd6   : > { %522 = vmatmul.bf16.gmra.mxu1 %v299_v36 }
  0xe5   : > { %478 = vmatmul.bf16.gmra.mxu0 %v300_v39 }
  0xe6   : > { %527 = vmatmul.bf16.gmra.mxu1 %v300_v39 }
  0xf2   : > { %v444_v41 = vpop.f32.mrf.mxu0 }
  0xf3   : > { %v493_v42 = vpop.f32.mrf.mxu1  ;;  %v445_v45 = vadd.f32 %v444_v41, %v1772_v43 }
  0xf4   : > { %v494_v46 = vadd.f32 %v493_v42, %v1774_v44 }
  0xf5   : > { %v533_v51 = vmax.f32 %v445_v45, 0.0 }
  0xf6   : > { %v534_v52 = vmax.f32 %v494_v46, 0.0 }
  0xfa   : > { %v446_v47 = vpop.f32.mrf.mxu0 }
  0xfb   : > { %v495_v48 = vpop.f32.mrf.mxu1  ;;  %v447_v49 = vadd.f32 %v446_v47, %v1772_v43 }
  0xfc   : > { %v496_v50 = vadd.f32 %v495_v48, %v1774_v44 }
  0xfd   : > { %v535_v53 = vmax.f32 %v447_v49, 0.0 }
  0xfe   : > { %v536_v54 = vmax.f32 %v496_v50, 0.0 }
  0xff   : > { %v1780_v55 = vpack.c.bf16 %v535_v53, %v533_v51 }
 0x100   : > { %v1782_v56 = vpack.c.bf16 %v536_v54, %v534_v52 }
 0x102   : > { %v449_v57 = vpop.f32.mrf.mxu0 }
 0x103   : > { %v498_v58 = vpop.f32.mrf.mxu1  ;;  %v450_v59 = vadd.f32 %v449_v57, %v1772_v43 }
 0x104   : > { %v499_v60 = vadd.f32 %v498_v58, %v1774_v44 }
 0x105   : > { %v537_v1 = vmax.f32 %v450_v59, 0.0 }
 0x106   : > { %v538_v2 = vmax.f32 %v499_v60, 0.0 }
 0x10a   : > { %v451_v61 = vpop.f32.mrf.mxu0 }
 0x10b   : > { %v500_v62 = vpop.f32.mrf.mxu1  ;;  %v452_v63 = vadd.f32 %v451_v61, %v1772_v43 }
 0x10c   : > { %v501_v0 = vadd.f32 %v500_v62, %v1774_v44 }
 0x10d   : > { %v539_v3 = vmax.f32 %v452_v63, 0.0 }
 0x10e   : > { %v540_v4 = vmax.f32 %v501_v0, 0.0 }
 0x10f   : > { %v1788_v5 = vpack.c.bf16 %v539_v3, %v537_v1 }
 0x110   : > { %v1790_v6 = vpack.c.bf16 %v540_v4, %v538_v2 }
 0x112   : > { %v454_v7 = vpop.f32.mrf.mxu0 }
 0x113   : > { %v503_v8 = vpop.f32.mrf.mxu1  ;;  %v455_v9 = vadd.f32 %v454_v7, %v1772_v43 }
 0x114   : > { %v504_v10 = vadd.f32 %v503_v8, %v1774_v44 }
 0x115   : > { %v541_v15 = vmax.f32 %v455_v9, 0.0 }
 0x116   : > { %v542_v16 = vmax.f32 %v504_v10, 0.0 }
 0x11a   : > { %v456_v11 = vpop.f32.mrf.mxu0 }
 0x11b   : > { %v505_v12 = vpop.f32.mrf.mxu1  ;;  %v457_v13 = vadd.f32 %v456_v11, %v1772_v43 }
 0x11c   : > { %v506_v14 = vadd.f32 %v505_v12, %v1774_v44 }
 0x11d   : > { %v543_v17 = vmax.f32 %v457_v13, 0.0 }
 0x11e   : > { %v544_v18 = vmax.f32 %v506_v14, 0.0 }
 0x11f   : > { %v1796_v19 = vpack.c.bf16 %v543_v17, %v541_v15 }
 0x120   : > { %v1798_v20 = vpack.c.bf16 %v544_v18, %v542_v16 }
 0x122   : > { %v459_v21 = vpop.f32.mrf.mxu0 }
 0x123   : > { %v508_v22 = vpop.f32.mrf.mxu1  ;;  %v460_v23 = vadd.f32 %v459_v21, %v1772_v43 }
 0x124   : > { %v509_v24 = vadd.f32 %v508_v22, %v1774_v44 }
 0x125   : > { %v545_v29 = vmax.f32 %v460_v23, 0.0 }
 0x126   : > { %v546_v30 = vmax.f32 %v509_v24, 0.0 }
 0x12a   : > { %v461_v25 = vpop.f32.mrf.mxu0 }
 0x12b   : > { %v510_v26 = vpop.f32.mrf.mxu1  ;;  %v462_v27 = vadd.f32 %v461_v25, %v1772_v43 }
 0x12c   : > { %v511_v28 = vadd.f32 %v510_v26, %v1774_v44 }
 0x12d   : > { %v547_v31 = vmax.f32 %v462_v27, 0.0 }
 0x12e   : > { %v548_v32 = vmax.f32 %v511_v28, 0.0 }
 0x12f   : > { %v1804_v33 = vpack.c.bf16 %v547_v31, %v545_v29 }
 0x130   : > { %v1806_v34 = vpack.c.bf16 %v548_v32, %v546_v30 }
 0x132   : > { %v464_v35 = vpop.f32.mrf.mxu0 }
 0x133   : > { %v513_v36 = vpop.f32.mrf.mxu1  ;;  %v465_v37 = vadd.f32 %v464_v35, %v1772_v43 }
 0x134   : > { %v514_v38 = vadd.f32 %v513_v36, %v1774_v44 }
 0x135   : > { %v549_v45 = vmax.f32 %v465_v37, 0.0  ;;  %v1558_v37 = vmov 0  }
 0x136   : > { %v550_v46 = vmax.f32 %v514_v38, 0.0  ;;  %1325 = vset.pattern.permute.xlu0 %v1558_v37  ;;  %1326 = vset.pattern.permute.xlu1 %v1558_v37 }
 0x137   : > { %1327 = vset.pattern.permute.xlu2 %v1558_v37 }
 0x13a   : > { %v466_v39 = vpop.f32.mrf.mxu0 }
 0x13b   : > { %v515_v40 = vpop.f32.mrf.mxu1  ;;  %v467_v41 = vadd.f32 %v466_v39, %v1772_v43 }
 0x13c   : > { %v516_v42 = vadd.f32 %v515_v40, %v1774_v44  ;;  %v1239_v40 = vld [vmem:[#allocation7 + $0x14] sm:$0xf0] }
 0x13d   : > { %v551_v47 = vmax.f32 %v467_v41, 0.0  ;;  %v1163_v41 = vld [vmem:[#allocation7 + $0x18] sm:$0xf0] }
 0x13e   : > { %v552_v48 = vmax.f32 %v516_v42, 0.0 }
 0x13f   : > { %v589_v49 = vpack.c.bf16 %v551_v47, %v549_v45  ;;  %v1241_v47 = vld [vmem:[#allocation7 + $0x24] sm:$0xf0] }
 0x140   : > { %v590_v50 = vpack.c.bf16 %v552_v48, %v550_v46  ;;  %v1169_v46 = vld [vmem:[#allocation7 + $0x20] sm:$0xf]  ;;  %v1240_v48 = vld [vmem:[#allocation7 + $0x24] sm:$0xf] }
 0x142   : > { %v469_v51 = vpop.f32.mrf.mxu0 }
 0x143   : > { %v518_v52 = vpop.f32.mrf.mxu1  ;;  %v470_v27 = vadd.f32 %v469_v51, %v1772_v43 }
 0x144   : > { %v519_v28 = vadd.f32 %v518_v52, %v1774_v44  ;;  %v603_v52 = vld [vmem:[%s1938_s4 + $0x30] sm:$0xff] }
 0x145   : > { %v553_v31 = vmax.f32 %v470_v27, 0.0  ;;  %v1203_v27 = vld [vmem:[#allocation7 + $0x68] sm:$0xf0] }
 0x146   : > { %v554_v32 = vmax.f32 %v519_v28, 0.0 }
 0x14a   : > { %v471_v53 = vpop.f32.mrf.mxu0 }
 0x14b   : > { %v520_v54 = vpop.f32.mrf.mxu1  ;;  %v472_v23 = vadd.f32 %v471_v53, %v1772_v43  ;;  %v601_v53 = vld [vmem:[%s1938_s4 + $0x20] sm:$0xff] }
 0x14c   : > { %v521_v24 = vadd.f32 %v520_v54, %v1774_v44  ;;  %v604_v54 = vld [vmem:[%s1938_s4 + $0x38] sm:$0xff]  ;;  %635 = vperm.xlu2 %1327, %v601_v53  }
 0x14d   : > { %v555_v29 = vmax.f32 %v472_v23, 0.0  ;;  %v611_v23 = vld [vmem:[%s1938_s4 + $0x70] sm:$0xff] }
 0x14e   : > { %v556_v30 = vmax.f32 %v521_v24, 0.0  ;;  %v1201_v24 = vld [vmem:[#allocation7 + $0x60] sm:$0xf] }
 0x14f   : > { %v591_v35 = vpack.c.bf16 %v555_v29, %v553_v31  ;;  %v1251_v31 = vld [vmem:[#allocation7 + $0x74] sm:$0xf0] }
 0x150   : > { %v592_v36 = vpack.c.bf16 %v556_v30, %v554_v32  ;;  %v1209_v30 = vld [vmem:[#allocation7 + $0x70] sm:$0xf]  ;;  %v1250_v32 = vld [vmem:[#allocation7 + $0x74] sm:$0xf] }
 0x152   : > { %v474_v57 = vpop.f32.mrf.mxu0 }
 0x153   : > { %v523_v58 = vpop.f32.mrf.mxu1  ;;  %v475_v15 = vadd.f32 %v474_v57, %v1772_v43  ;;  %v1177_v57 = vld [vmem:[#allocation7 + $0x30] sm:$0xf] }
 0x154   : > { %v524_v16 = vadd.f32 %v523_v58, %v1774_v44  ;;  %v1243_v58 = vld [vmem:[#allocation7 + $0x34] sm:$0xf0] }
 0x155   : > { %v557_v21 = vmax.f32 %v475_v15, 0.0  ;;  %v1247_v15 = vld [vmem:[#allocation7 + $0x54] sm:$0xf0] }
 0x156   : > { %v558_v22 = vmax.f32 %v524_v16, 0.0  ;;  %v1246_v16 = vld [vmem:[#allocation7 + $0x54] sm:$0xf] }
 0x15a   : > { %v476_v59 = vpop.f32.mrf.mxu0 }
 0x15b   : > { %v525_v60 = vpop.f32.mrf.mxu1  ;;  %v477_v11 = vadd.f32 %v476_v59, %v1772_v43  ;;  %v1242_v59 = vld [vmem:[#allocation7 + $0x34] sm:$0xf] }
 0x15c   : > { %v526_v12 = vadd.f32 %v525_v60, %v1774_v44  ;;  %v1179_v60 = vld [vmem:[#allocation7 + $0x38] sm:$0xf0] }
 0x15d   : > { %v559_v17 = vmax.f32 %v477_v11, 0.0  ;;  %v612_v11 = vld [vmem:[%s1938_s4 + $0x78] sm:$0xff] }
 0x15e   : > { %v560_v18 = vmax.f32 %v526_v12, 0.0  ;;  %v605_v12 = vld [vmem:[%s1938_s4 + $0x40] sm:$0xff] }
 0x15f   : > { %v593_v25 = vpack.c.bf16 %v559_v17, %v557_v21  ;;  %v1195_v17 = vld [vmem:[#allocation7 + $0x58] sm:$0xf0] }
 0x160   : > { %v594_v26 = vpack.c.bf16 %v560_v18, %v558_v22  ;;  %v1198_v21 = vor.u32 %v1246_v16, %v1195_v17  ;;  %v608_v22 = vld [vmem:[%s1938_s4 + $0x58] sm:$0xff] }
 0x162   : > { %v479_v61 = vpop.f32.mrf.mxu0 }
 0x163   : > { %v528_v62 = vpop.f32.mrf.mxu1  ;;  %v480_v63 = vadd.f32 %v479_v61, %v1772_v43  ;;  %v1178_v61 = vor.u32 %v1243_v58, %v1177_v57 }
 0x164   : > { %v529_v0 = vadd.f32 %v528_v62, %v1774_v44  ;;  %v1182_v62 = vor.u32 %v1242_v59, %v1179_v60 }
 0x165   : > { %v561_v7 = vmax.f32 %v480_v63, 0.0  ;;  %v602_v63 = vld [vmem:[%s1938_s4 + $0x28] sm:$0xff] }
 0x166   : > { %v562_v8 = vmax.f32 %v529_v0, 0.0  ;;  %v606_v0 = vld [vmem:[%s1938_s4 + $0x48] sm:$0xff]  ;;  %640 = vperm.xlu2 %1327, %v602_v63  }
 0x16a   : > { %v481_v1 = vpop.f32.mrf.mxu0 }
 0x16b   : > { %v530_v2 = vpop.f32.mrf.mxu1  ;;  %v482_v3 = vadd.f32 %v481_v1, %v1772_v43  ;;  %v597_v43 = vld [vmem:[%s1938_s4] sm:$0xff] }
 0x16c   : > { %v531_v4 = vadd.f32 %v530_v2, %v1774_v44  ;;  %615 = vperm.xlu0 %1325, %v597_v43   ;;  %v598_v44 = vld [vmem:[%s1938_s4 + $0x8] sm:$0xff]  ;;  %v609_v1 = vld [vmem:[%s1938_s4 + $0x60] sm:$0xff] }
 0x16d   : > { %v563_v9 = vmax.f32 %v482_v3, 0.0  ;;  %v1185_v2 = vld [vmem:[#allocation7 + $0x40] sm:$0xf]  ;;  %v1245_v3 = vld [vmem:[#allocation7 + $0x44] sm:$0xf0] }
 0x16e   : > { %v564_v10 = vmax.f32 %v531_v4, 0.0  ;;  %v1244_v4 = vld [vmem:[#allocation7 + $0x44] sm:$0xf]  ;;  %655 = vperm.xlu2 %1327, %v605_v12  }
 0x16f   : > { %v595_v13 = vpack.c.bf16 %v563_v9, %v561_v7  ;;  %v1187_v7 = vld [vmem:[#allocation7 + $0x48] sm:$0xf0] }
 0x170   : > { %v596_v14 = vpack.c.bf16 %v564_v10, %v562_v8  ;;  %v1186_v8 = vor.u32 %v1245_v3, %v1185_v2  ;;  %v1190_v9 = vor.u32 %v1244_v4, %v1187_v7  ;;  %v607_v10 = vld [vmem:[%s1938_s4 + $0x50] sm:$0xff] }
 0x171   : > { %773 = vmatpush.bf16.xpose.msra.mxu2 %v595_v13  ;;  %v610_v13 = vld [vmem:[%s1938_s4 + $0x68] sm:$0xff] }
 0x172   : > { %822 = vmatpush.bf16.xpose.msra.mxu3 %v596_v14  ;;  %v1193_v14 = vld [vmem:[#allocation7 + $0x50] sm:$0xf] }
 0x173   : > { %v1194_v18 = vor.u32 %v1247_v15, %v1193_v14 }
 0x174   : > { %620 = vperm.xlu0 %1325, %v598_v44  }
 0x176   : > { %670 = vperm.xlu2 %1327, %v608_v22  }
 0x179   : > { %774 = vmatpush.bf16.xpose.msra.mxu2 %v593_v25  ;;  %v1249_v25 = vld [vmem:[#allocation7 + $0x64] sm:$0xf0] }
 0x17a   : > { %823 = vmatpush.bf16.xpose.msra.mxu3 %v594_v26  ;;  %v1248_v26 = vld [vmem:[#allocation7 + $0x64] sm:$0xf]  ;;  %v1202_v28 = vor.u32 %v1249_v25, %v1201_v24 }
 0x17b   : > { %v1206_v29 = vor.u32 %v1248_v26, %v1203_v27 }
 0x17c   : > { %645 = vperm.xlu0 %1325, %v603_v52  }
 0x17e   : > { %685 = vperm.xlu2 %1327, %v611_v23  }
 0x181   : > { %775 = vmatpush.bf16.xpose.msra.mxu2 %v591_v35  ;;  %v1211_v35 = vld [vmem:[#allocation7 + $0x78] sm:$0xf0] }
 0x182   : > { %824 = vmatpush.bf16.xpose.msra.mxu3 %v592_v36  ;;  %v1210_v36 = vor.u32 %v1251_v31, %v1209_v30  ;;  %v1214_v37 = vor.u32 %v1250_v32, %v1211_v35 }
 0x184   : > { %660 = vperm.xlu0 %1325, %v606_v0  }
 0x189   : > { %776 = vmatpush.bf16.xpose.msra.mxu2 %v589_v49  ;;  %v1171_v49 = vld [vmem:[#allocation7 + $0x28] sm:$0xf0] }
 0x18a   : > { %825 = vmatpush.bf16.xpose.msra.mxu3 %v590_v50  ;;  %v1170_v50 = vor.u32 %v1241_v47, %v1169_v46  ;;  %v1174_v51 = vor.u32 %v1240_v48, %v1171_v49 }
 0x18c   : > { %675 = vperm.xlu0 %1325, %v609_v1  }
 0x191   : > { %777 = vmatpush.bf16.xpose.msra.mxu2 %v1804_v33  ;;  %v1153_v33 = vld [vmem:[#allocation7] sm:$0xf] }
 0x192   : > { %826 = vmatpush.bf16.xpose.msra.mxu3 %v1806_v34  ;;  %v1155_v34 = vld [vmem:[#allocation7 + $0x8] sm:$0xf0] }
 0x194   : > { %690 = vperm.xlu0 %1325, %v612_v11  }
 0x199   : > { %778 = vmatpush.bf16.xpose.msra.mxu2 %v1796_v19  ;;  %v1237_v19 = vld [vmem:[#allocation7 + $0x4] sm:$0xf0] }
 0x19a   : > { %827 = vmatpush.bf16.xpose.msra.mxu3 %v1798_v20  ;;  %v1236_v20 = vld [vmem:[#allocation7 + $0x4] sm:$0xf]  ;;  %v1154_v38 = vor.u32 %v1237_v19, %v1153_v33 }
 0x19b   : > { %v1158_v39 = vor.u32 %v1236_v20, %v1155_v34 }
 0x1a1   : > { %779 = vmatpush.bf16.xpose.msra.mxu2 %v1788_v5  ;;  %v599_v5 = vld [vmem:[%s1938_s4 + $0x10] sm:$0xff] }
 0x1a2   : > { %828 = vmatpush.bf16.xpose.msra.mxu3 %v1790_v6  ;;  %625 = vperm.xlu1 %1326, %v599_v5   ;;  %v600_v6 = vld [vmem:[%s1938_s4 + $0x18] sm:$0xff] }
 0x1a6   : > { %v636_v63 = vpop.permute.xlu2 %635 }
 0x1a9   : > { %780 = vmatpush.bf16.xpose.msra.mxu2 %v1780_v55  ;;  %v1161_v55 = vld [vmem:[#allocation7 + $0x10] sm:$0xf] }
 0x1aa   : > { %829 = vmatpush.bf16.xpose.msra.mxu3 %v1782_v56  ;;  %v1238_v56 = vld [vmem:[#allocation7 + $0x14] sm:$0xf]  ;;  %630 = vperm.xlu1 %1326, %v600_v6   ;;  %v1162_v42 = vor.u32 %v1239_v40, %v1161_v55 }
 0x1ab   : > { %v1166_v45 = vor.u32 %v1238_v56, %v1163_v41 }
 0x1b0   : > { %781 = vmatmul.bf16.vlgmr.msra.gmra.mxu2 %v1154_v38 }
 0x1b1   : > { %830 = vmatmul.bf16.vlgmr.msra.gmra.mxu3 %v1158_v39 }
 0x1b2   : > { %650 = vperm.xlu1 %1326, %v604_v54  }
 0x1ba   : > { %665 = vperm.xlu1 %1326, %v607_v10  }
 0x1c0   : > { %786 = vmatmul.bf16.gmra.mxu2 %v1162_v42  ;;  %v641_v12 = vpop.permute.xlu2 %640 }
 0x1c1   : > { %835 = vmatmul.bf16.gmra.mxu3 %v1166_v45 }
 0x1c2   : > { %680 = vperm.xlu1 %1326, %v610_v13  }
 0x1d0   : > { %791 = vmatmul.bf16.gmra.mxu2 %v1170_v50 }
 0x1d1   : > { %840 = vmatmul.bf16.gmra.mxu3 %v1174_v51 }
 0x1de   : > { %v616_v43 = vpop.permute.xlu0 %615 }
 0x1e0   : > { %796 = vmatmul.bf16.gmra.mxu2 %v1178_v61 }
 0x1e1   : > { %845 = vmatmul.bf16.gmra.mxu3 %v1182_v62 }
 0x1e6   : > { %v621_v38 = vpop.permute.xlu0 %620 }
 0x1ee   : > { %v646_v24 = vpop.permute.xlu0 %645 }
 0x1f0   : > { %801 = vmatmul.bf16.gmra.mxu2 %v1186_v8 }
 0x1f1   : > { %850 = vmatmul.bf16.gmra.mxu3 %v1190_v9 }
 0x200   : > { %806 = vmatmul.bf16.gmra.mxu2 %v1194_v18 }
 0x201   : > { %855 = vmatmul.bf16.gmra.mxu3 %v1198_v21 }
 0x210   : > { %811 = vmatmul.bf16.gmra.mxu2 %v1202_v28 }
 0x211   : > { %860 = vmatmul.bf16.gmra.mxu3 %v1206_v29 }
 0x214   : > { %v626_v56 = vpop.permute.xlu1 %625 }
 0x21c   : > { %v631_v52 = vpop.permute.xlu1 %630 }
 0x220   : > { %816 = vmatmul.bf16.gmra.mxu2 %v1210_v36 }
 0x221   : > { %865 = vmatmul.bf16.gmra.mxu3 %v1214_v37 }
 0x224   : > { %v651_v36 = vpop.permute.xlu1 %650 }
 0x233   : > { %v782_v44 = vpop.f32.mrf.mxu2 }
 0x234   : > { %v831_v33 = vpop.f32.mrf.mxu3  ;;  %v783_v19 = vadd.f32 %v782_v44, %v616_v43 }
 0x236   : > { %v832_v20 = vadd.f32 %v831_v33, %v783_v19 }
 0x238   : > { %v871_v34 = vsub.f32 0.0, %v832_v20 }
 0x23a   : > { %v887_v39 = vmul.f32 1.442695, %v871_v34 }
 0x23b   : > { %v784_v5 = vpop.f32.mrf.mxu2 }
 0x23c   : > { %v833_v6 = vpop.f32.mrf.mxu3  ;;  %1328 = vpow2.f32 %v887_v39  ;;  %v785_v55 = vadd.f32 %v784_v5, %v621_v38  ;;  %v656_v5 = vpop.permute.xlu2 %655 }
 0x23e   : > { %v834_v40 = vadd.f32 %v833_v6, %v785_v55 }
 0x240   : > { %v872_v41 = vsub.f32 0.0, %v834_v40 }
 0x242   : > { %v1329_v42 = vpop.eup %1328  ;;  %v889_v45 = vmul.f32 1.442695, %v872_v41 }
 0x243   : > { %v919_v46 = vadd.f32 1.0, %v1329_v42  ;;  %v787_v47 = vpop.f32.mrf.mxu2 }
 0x244   : > { %v836_v48 = vpop.f32.mrf.mxu3  ;;  %1330 = vpow2.f32 %v889_v45  ;;  %v788_v49 = vadd.f32 %v787_v47, %v626_v56 }
 0x245   : > { %1332 = vrcp.f32 %v919_v46 }
 0x246   : > { %v837_v50 = vadd.f32 %v836_v48, %v788_v49  ;;  %v661_v49 = vpop.permute.xlu0 %660 }
 0x248   : > { %v873_v51 = vsub.f32 0.0, %v837_v50 }
 0x24a   : > { %v1331_v53 = vpop.eup %1330  ;;  %v891_v54 = vmul.f32 1.442695, %v873_v51 }
 0x24b   : > { %v1333_v57 = vpop.eup %1332  ;;  %v920_v58 = vadd.f32 1.0, %v1331_v53  ;;  %v789_v59 = vpop.f32.mrf.mxu2 }
 0x24c   : > { %v838_v60 = vpop.f32.mrf.mxu3  ;;  %951 = vst [vmem:[%s1882_s17] sm:$0xff] %v1333_v57  ;;  %1334 = vpow2.f32 %v891_v54  ;;  %v790_v61 = vadd.f32 %v789_v59, %v631_v52 }
 0x24d   : > { %1336 = vrcp.f32 %v920_v58 }
 0x24e   : > { %v839_v62 = vadd.f32 %v838_v60, %v790_v61  ;;  %v666_v60 = vpop.permute.xlu1 %665 }
 0x250   : > { %v874_v0 = vsub.f32 0.0, %v839_v62 }
 0x252   : > { %v1335_v1 = vpop.eup %1334  ;;  %v893_v2 = vmul.f32 1.442695, %v874_v0 }
 0x253   : > { %v1337_v3 = vpop.eup %1336  ;;  %v921_v4 = vadd.f32 1.0, %v1335_v1  ;;  %v792_v7 = vpop.f32.mrf.mxu2 }
 0x254   : > { %v841_v8 = vpop.f32.mrf.mxu3  ;;  %952 = vst [vmem:[%s1882_s17 + $0x8] sm:$0xff] %v1337_v3  ;;  %1338 = vpow2.f32 %v893_v2  ;;  %v793_v9 = vadd.f32 %v792_v7, %v636_v63 }
 0x255   : > { %1340 = vrcp.f32 %v921_v4 }
 0x256   : > { %v842_v10 = vadd.f32 %v841_v8, %v793_v9  ;;  %v671_v9 = vpop.permute.xlu2 %670 }
 0x258   : > { %v875_v11 = vsub.f32 0.0, %v842_v10 }
 0x25a   : > { %v1339_v13 = vpop.eup %1338  ;;  %v895_v14 = vmul.f32 1.442695, %v875_v11 }
 0x25b   : > { %v1341_v15 = vpop.eup %1340  ;;  %v922_v16 = vadd.f32 1.0, %v1339_v13  ;;  %v794_v17 = vpop.f32.mrf.mxu2 }
 0x25c   : > { %v843_v18 = vpop.f32.mrf.mxu3  ;;  %953 = vst [vmem:[%s1882_s17 + $0x10] sm:$0xff] %v1341_v15  ;;  %1342 = vpow2.f32 %v895_v14  ;;  %v795_v21 = vadd.f32 %v794_v17, %v641_v12 }
 0x25d   : > { %1344 = vrcp.f32 %v922_v16 }
 0x25e   : > { %v844_v22 = vadd.f32 %v843_v18, %v795_v21  ;;  %v676_v21 = vpop.permute.xlu0 %675 }
 0x260   : > { %v876_v23 = vsub.f32 0.0, %v844_v22 }
 0x262   : > { %v1343_v25 = vpop.eup %1342  ;;  %v897_v26 = vmul.f32 1.442695, %v876_v23 }
 0x263   : > { %v1345_v27 = vpop.eup %1344  ;;  %v923_v28 = vadd.f32 1.0, %v1343_v25  ;;  %v797_v29 = vpop.f32.mrf.mxu2 }
 0x264   : > { %v846_v30 = vpop.f32.mrf.mxu3  ;;  %954 = vst [vmem:[%s1882_s17 + $0x18] sm:$0xff] %v1345_v27  ;;  %1346 = vpow2.f32 %v897_v26  ;;  %v798_v31 = vadd.f32 %v797_v29, %v646_v24 }
 0x265   : > { %1348 = vrcp.f32 %v923_v28 }
 0x266   : > { %v847_v32 = vadd.f32 %v846_v30, %v798_v31  ;;  %v681_v31 = vpop.permute.xlu1 %680 }
 0x268   : > { %v877_v35 = vsub.f32 0.0, %v847_v32 }
 0x26a   : > { %v1347_v37 = vpop.eup %1346  ;;  %v899_v43 = vmul.f32 1.442695, %v877_v35 }
 0x26b   : > { %v1349_v44 = vpop.eup %1348  ;;  %v924_v33 = vadd.f32 1.0, %v1347_v37  ;;  %v799_v19 = vpop.f32.mrf.mxu2 }
 0x26c   : > { %v848_v20 = vpop.f32.mrf.mxu3  ;;  %955 = vst [vmem:[%s1882_s17 + $0x20] sm:$0xff] %v1349_v44  ;;  %1350 = vpow2.f32 %v899_v43  ;;  %v800_v34 = vadd.f32 %v799_v19, %v651_v36 }
 0x26d   : > { %1352 = vrcp.f32 %v924_v33 }
 0x26e   : > { %v849_v38 = vadd.f32 %v848_v20, %v800_v34  ;;  %v686_v34 = vpop.permute.xlu2 %685 }
 0x270   : > { %v878_v39 = vsub.f32 0.0, %v849_v38 }
 0x272   : > { %v1351_v6 = vpop.eup %1350  ;;  %v901_v55 = vmul.f32 1.442695, %v878_v39 }
 0x273   : > { %v1353_v40 = vpop.eup %1352  ;;  %v925_v56 = vadd.f32 1.0, %v1351_v6  ;;  %v802_v41 = vpop.f32.mrf.mxu2 }
 0x274   : > { %v851_v42 = vpop.f32.mrf.mxu3  ;;  %956 = vst [vmem:[%s1882_s17 + $0x28] sm:$0xff] %v1353_v40  ;;  %1354 = vpow2.f32 %v901_v55  ;;  %v803_v45 = vadd.f32 %v802_v41, %v656_v5 }
 0x275   : > { %1356 = vrcp.f32 %v925_v56 }
 0x276   : > { %v852_v46 = vadd.f32 %v851_v42, %v803_v45 }
 0x278   : > { %v879_v47 = vsub.f32 0.0, %v852_v46 }
 0x27a   : > { %v1355_v48 = vpop.eup %1354  ;;  %v903_v50 = vmul.f32 1.442695, %v879_v47  ;;  %v691_v47 = vpop.permute.xlu0 %690 }
 0x27b   : > { %v1357_v51 = vpop.eup %1356  ;;  %v926_v52 = vadd.f32 1.0, %v1355_v48  ;;  %v804_v53 = vpop.f32.mrf.mxu2 }
 0x27c   : > { %v853_v54 = vpop.f32.mrf.mxu3  ;;  %957 = vst [vmem:[%s1882_s17 + $0x30] sm:$0xff] %v1357_v51  ;;  %1358 = vpow2.f32 %v903_v50  ;;  %v805_v57 = vadd.f32 %v804_v53, %v661_v49 }
 0x27d   : > { %1360 = vrcp.f32 %v926_v52 }
 0x27e   : > { %v854_v58 = vadd.f32 %v853_v54, %v805_v57 }
 0x280   : > { %v880_v59 = vsub.f32 0.0, %v854_v58 }
 0x282   : > { %v1359_v61 = vpop.eup %1358  ;;  %v905_v62 = vmul.f32 1.442695, %v880_v59 }
 0x283   : > { %v1361_v63 = vpop.eup %1360  ;;  %v927_v0 = vadd.f32 1.0, %v1359_v61  ;;  %v807_v1 = vpop.f32.mrf.mxu2 }
 0x284   : > { %v856_v2 = vpop.f32.mrf.mxu3  ;;  %958 = vst [vmem:[%s1882_s17 + $0x38] sm:$0xff] %v1361_v63  ;;  %1362 = vpow2.f32 %v905_v62  ;;  %v808_v3 = vadd.f32 %v807_v1, %v666_v60 }
 0x285   : > { %1364 = vrcp.f32 %v927_v0 }
 0x286   : > { %v857_v4 = vadd.f32 %v856_v2, %v808_v3 }
 0x288   : > { %v881_v7 = vsub.f32 0.0, %v857_v4 }
 0x28a   : > { %v1363_v8 = vpop.eup %1362  ;;  %v907_v10 = vmul.f32 1.442695, %v881_v7 }
 0x28b   : > { %v1365_v11 = vpop.eup %1364  ;;  %v928_v12 = vadd.f32 1.0, %v1363_v8  ;;  %v809_v13 = vpop.f32.mrf.mxu2 }
 0x28c   : > { %v858_v14 = vpop.f32.mrf.mxu3  ;;  %959 = vst [vmem:[%s1882_s17 + $0x40] sm:$0xff] %v1365_v11  ;;  %1366 = vpow2.f32 %v907_v10  ;;  %v810_v15 = vadd.f32 %v809_v13, %v671_v9 }
 0x28d   : > { %1368 = vrcp.f32 %v928_v12 }
 0x28e   : > { %v859_v16 = vadd.f32 %v858_v14, %v810_v15 }
 0x290   : > { %v882_v17 = vsub.f32 0.0, %v859_v16 }
 0x292   : > { %v1367_v18 = vpop.eup %1366  ;;  %v909_v22 = vmul.f32 1.442695, %v882_v17 }
 0x293   : > { %v1369_v23 = vpop.eup %1368  ;;  %v929_v24 = vadd.f32 1.0, %v1367_v18  ;;  %v812_v25 = vpop.f32.mrf.mxu2 }
 0x294   : > { %v861_v26 = vpop.f32.mrf.mxu3  ;;  %960 = vst [vmem:[%s1882_s17 + $0x48] sm:$0xff] %v1369_v23  ;;  %1370 = vpow2.f32 %v909_v22  ;;  %v813_v27 = vadd.f32 %v812_v25, %v676_v21 }
 0x295   : > { %1372 = vrcp.f32 %v929_v24 }
 0x296   : > { %v862_v28 = vadd.f32 %v861_v26, %v813_v27 }
 0x298   : > { %v883_v29 = vsub.f32 0.0, %v862_v28 }
 0x29a   : > { %v1371_v30 = vpop.eup %1370  ;;  %v911_v32 = vmul.f32 1.442695, %v883_v29 }
 0x29b   : > { %v1373_v35 = vpop.eup %1372  ;;  %v930_v36 = vadd.f32 1.0, %v1371_v30  ;;  %v814_v37 = vpop.f32.mrf.mxu2 }
 0x29c   : > { %v863_v43 = vpop.f32.mrf.mxu3  ;;  %961 = vst [vmem:[%s1882_s17 + $0x50] sm:$0xff] %v1373_v35  ;;  %1374 = vpow2.f32 %v911_v32  ;;  %v815_v44 = vadd.f32 %v814_v37, %v681_v31 }
 0x29d   : > { %1376 = vrcp.f32 %v930_v36 }
 0x29e   : > { %v864_v33 = vadd.f32 %v863_v43, %v815_v44 }
 0x2a0   : > { %v884_v19 = vsub.f32 0.0, %v864_v33 }
 0x2a2   : > { %v1375_v20 = vpop.eup %1374  ;;  %v913_v38 = vmul.f32 1.442695, %v884_v19 }
 0x2a3   : > { %v1377_v39 = vpop.eup %1376  ;;  %v931_v5 = vadd.f32 1.0, %v1375_v20  ;;  %v817_v6 = vpop.f32.mrf.mxu2 }
 0x2a4   : > { %v866_v55 = vpop.f32.mrf.mxu3  ;;  %962 = vst [vmem:[%s1882_s17 + $0x58] sm:$0xff] %v1377_v39  ;;  %1378 = vpow2.f32 %v913_v38  ;;  %v818_v40 = vadd.f32 %v817_v6, %v686_v34 }
 0x2a5   : > { %1380 = vrcp.f32 %v931_v5 }
 0x2a6   : > { %v867_v56 = vadd.f32 %v866_v55, %v818_v40 }
 0x2a8   : > { %v885_v41 = vsub.f32 0.0, %v867_v56 }
 0x2aa   : > { %v1379_v42 = vpop.eup %1378  ;;  %v915_v45 = vmul.f32 1.442695, %v885_v41 }
 0x2ab   : > { %v1381_v46 = vpop.eup %1380  ;;  %v932_v48 = vadd.f32 1.0, %v1379_v42  ;;  %v819_v49 = vpop.f32.mrf.mxu2 }
 0x2ac   : > { %963 = vst [vmem:[%s1882_s17 + $0x60] sm:$0xff] %v1381_v46  ;;  %1382 = vpow2.f32 %v915_v45  ;;  %v820_v50 = vadd.f32 %v819_v49, %v691_v47  ;;  %v868_v51 = vpop.f32.mrf.mxu3 }
 0x2ad   : > { %1384 = vrcp.f32 %v932_v48 }
 0x2ae   : > { %v869_v52 = vadd.f32 %v868_v51, %v820_v50 }
 0x2b0   : > { %v886_v53 = vsub.f32 0.0, %v869_v52 }
 0x2b2   : > { %v1383_v54 = vpop.eup %1382  ;;  %v917_v57 = vmul.f32 1.442695, %v886_v53 }
 0x2b3   : > { %v1385_v58 = vpop.eup %1384  ;;  %v933_v59 = vadd.f32 1.0, %v1383_v54 }
 0x2b4   : > { %964 = vst [vmem:[%s1882_s17 + $0x68] sm:$0xff] %v1385_v58  ;;  %1386 = vpow2.f32 %v917_v57 }
 0x2b5   : > { %1388 = vrcp.f32 %v933_v59 }
 0x2ba   : > { %v1387_v60 = vpop.eup %1386 }
 0x2bb   : > { %v1389_v61 = vpop.eup %1388  ;;  %v934_v62 = vadd.f32 1.0, %v1387_v60 }
 0x2bc   : > { %965 = vst [vmem:[%s1882_s17 + $0x70] sm:$0xff] %v1389_v61 }
 0x2bd   : > { %1390 = vrcp.f32 %v934_v62 }
 0x2c3   : > { %v1391_v63 = vpop.eup %1390 }
 0x2c4   : > { %966 = vst [vmem:[%s1882_s17 + $0x78] sm:$0xff] %v1391_v63 }
 0x2c5   : > { %1509 = shalt.err (!%p1506_p8)
}
 0x2c6   : > { %s1559_s25 = smov 128   ;;  %s1560_s29 = smov 256  }
 0x2c7   : > { %s1561_s14 = smov 8  }
 0x2c8   : > { %1262 = dma.vmem_to_hbm [thread:$0]  (%p1644_p11), %s980_s20, 2048, %s982_s11, %s968_s13, %s1559_s25, %s1560_s29, %s1561_s14  }
 0x2c9 PF: > { %s996_s10 = sand.u32 1, %s1540_s18   ;;  %p1953_p9 = scmp.ge.s32.totalorder %s1552_s21, 2 }
 0x2ca   : > { %s997_s28 = scalar_lea.sflag [#allocation4], %s996_s10 }
 0x2cb   : > { %p1276_p10 = pnand %p1953_p9, %p1648_p12 }
 0x2cd   : > { %p1277_p1 = pneg %p1276_p10 }
 0x2cf   : > { %1535 = dma.done.wait (%p1277_p1), %s997_s28, 2048  }
 0x2d0   : > { %1537 = vsyncadd (%p1277_p1), %s997_s28, 4294965248  ;;  %s1954_s12 = sld [smem:[#allocation12_spill]]  ;;  %p19_p2 = scmp.ge.s32.totalorder %s1617_s24, 4  }
 0x2d1   : > { %s1955_s20 = sld [smem:[#allocation13_spill]]  ;;  %s1956_s18 = smov %s1544_s19 }
 0x2d2   : > { %s1958_s21 = smov %s1617_s24  ;;  %21 = sbr.rel (!%p19_p2) target bundleno = 9 (0x9), region = 93 }
 0x2d6   : > { %s1957_s19 = smov %s1954_s12 }
 0x2d7   :  { %1003 = vsyncpa [#allocation3], 1 }
 0x2d8   :  { %1005 = vsyncpa [#allocation3 + $0x1], 1 }
 0x2d9   :  { %1006 = vsyncpa [#allocation6], 1 }
 0x2da   :  { %1007 = vsyncpa [#allocation4], 1 }
 0x2db   :  { %1009 = vsyncpa [#allocation4 + $0x1], 1 }

</bundles_post_ra>
